<compile_context>
chip_gen: v5e
topology: v5e:2x2
jax: 0.10.0
libtpu: 0.0.40
codegen_flags: <defaults>
</compile_context>

<pallas_src>
import functools

import jax
import jax.numpy as jnp
import numpy as np
from jax.experimental import pallas as pl
from jax.experimental.pallas import tpu as pltpu

LANE = 128


def _round_up(x, m):
    return ((x + m - 1) // m) * m


def _silu(x):
    return x * jax.nn.sigmoid(x)


def _pad2(a, rows, cols):
    return jnp.pad(a, ((0, rows - a.shape[0]), (0, cols - a.shape[1])))


def _vmem_limit_bytes():
    # ~96 MiB on v5e/v6e (128 MiB physical VMEM), ~48 MiB on v7x (64 MiB).
    try:
        cap = int(pltpu.get_tpu_info().vmem_capacity_bytes)
    except Exception:
        cap = 64 * 1024 * 1024  # conservative fallback (v7x-sized)
    return (cap * 3) // 4


# --------------------------------------------------------------------------
# Kernel 1: inv_dense over node tiles:  phi = silu(s @ W1 + b1) @ W2 + b2
# (s, W1, W2 are bf16 MXU operands; accumulation + biases in f32)
# --------------------------------------------------------------------------
def _inv_dense_kernel(s_ref, w1_ref, b1_ref, w2_ref, b2_ref, phi_ref):
    h = jnp.dot(s_ref[...], w1_ref[...],
                preferred_element_type=jnp.float32) + b1_ref[...]
    h = _silu(h)
    phi = jnp.dot(h.astype(jnp.bfloat16), w2_ref[...],
                  preferred_element_type=jnp.float32) + b2_ref[...]
    phi_ref[...] = phi.astype(phi_ref.dtype)


# --------------------------------------------------------------------------
# Kernel 2: per-edge-tile RBF filter + gather + multiply
# --------------------------------------------------------------------------
def _edge_message_kernel(dist_ref, idx_ref, phi_ref, coef_ref, w_rbf_ref,
                         b_rbf_ref, out_ref, *, cutoff, n_nodes, use_onehot):
    d = dist_ref[...]                                      # [TILE_E, 1] f32
    idx = idx_ref[...]                                     # [TILE_E, 1] int32

    # Per-edge scalars (all on a [TILE_E, 1] column -> cheap).
    in_range = (d < cutoff).astype(jnp.float32)
    denom = jnp.where(d == 0.0, 1.0, d)                    # safe at d == 0
    inv_d = in_range / denom                               # 1/d, masked beyond cutoff
    env = 0.5 * (jnp.cos((jnp.pi / cutoff) * d) + 1.0) * in_range
    scale = inv_d * env                                    # folded per-edge scale

    # Raw sin basis: sin(n*pi*d/cutoff). 1/d, cutoff mask and envelope are
    # applied after the matmul as a single per-edge scale (linearity of @).
    sin_mat = jnp.sin(d * coef_ref[...]).astype(jnp.bfloat16)   # [TILE_E, n_rbf_p]
    w_s = jnp.dot(sin_mat, w_rbf_ref[...],
                  preferred_element_type=jnp.float32)            # [TILE_E, F_out_p]
    w_s = w_s * scale + b_rbf_ref[...] * env

    # Gather phi rows for each edge's j-node.
    if use_onehot:
        # Small graphs: one-hot MXU matmul (no XLU / per-row DMA).
        node_iota = jax.lax.broadcasted_iota(jnp.int32, (1, n_nodes), 1)
        onehot = (idx == node_iota).astype(jnp.bfloat16)         # [TILE_E, n_nodes]
        phi_j = jnp.dot(onehot, phi_ref[...],
                        preferred_element_type=jnp.float32)
    else:
        # Large graphs: real gather on the VMEM-resident phi (MXU cost of the
        # one-hot path scales linearly with n_nodes and is wasted work here).
        phi_j = jnp.take(phi_ref[...], idx[:, 0], axis=0).astype(jnp.float32)

    out_ref[...] = (phi_j * w_s).astype(out_ref.dtype)


# --------------------------------------------------------------------------
# Wrapper
# --------------------------------------------------------------------------
def invariant_message(s_j, dist, nbrs, params, cutoff, *,
                      tile_n=256, tile_e=512, out_dtype=jnp.bfloat16,
                      onehot_gather_max_nodes=2048):
    n_nodes, f_in = s_j.shape
    n_edges = dist.shape[0]
    n_rbf, f_out = params["w_rbf"].shape

    # Clamp tiles for tiny inputs (avoids huge padding), keep them big otherwise.
    tile_n = _round_up(max(16, min(tile_n, _round_up(n_nodes, 16))), 16)
    tile_e = _round_up(max(128, min(tile_e, _round_up(n_edges, 128))), 128)

    f_in_p = _round_up(f_in, LANE)
    f_out_p = _round_up(f_out, LANE)
    n_rbf_p = _round_up(n_rbf, LANE)
    n_p = _round_up(n_nodes, tile_n)
    e_p = _round_up(n_edges, tile_e)

    vmem_limit = _vmem_limit_bytes()

    # Pad feature dims to 128 lanes; matmul weights in bf16, biases in f32.
    w1 = _pad2(params["w1"], f_in_p, f_in_p).astype(jnp.bfloat16)
    b1 = _pad2(params["b1"].reshape(1, -1), 1, f_in_p).astype(jnp.float32)
    w2 = _pad2(params["w2"], f_in_p, f_out_p).astype(jnp.bfloat16)
    b2 = _pad2(params["b2"].reshape(1, -1), 1, f_out_p).astype(jnp.float32)
    w_rbf = _pad2(params["w_rbf"], n_rbf_p, f_out_p).astype(jnp.bfloat16)
    b_rbf = _pad2(params["b_rbf"].reshape(1, -1), 1, f_out_p).astype(jnp.float32)
    coef = jnp.arange(1, n_rbf + 1, dtype=jnp.float32) * jnp.pi / cutoff
    coef = _pad2(coef.reshape(1, -1), 1, n_rbf_p)     # padded coef=0 -> sin col=0

    # bf16 node features: halves kernel-1 input HBM traffic, no in-kernel cast.
    s_pad = _pad2(s_j.astype(jnp.bfloat16), n_p, f_in_p)
    dist_pad = _pad2(dist.reshape(-1, 1).astype(jnp.float32), e_p, 1)
    idx_pad = _pad2(nbrs[:, 1].reshape(-1, 1).astype(jnp.int32), e_p, 1)
    # NOTE: padded edge rows (dist=0, idx=0) produce garbage that is removed
    # by the final [:n_edges] slice; never drop that slice.

    full = lambda shape: pl.BlockSpec(shape, lambda i: (0,) * len(shape))

    # ---- kernel 1: node MLP (inv_dense) -> phi [n_p, f_out_p] in bf16 ----
    phi = pl.pallas_call(
        _inv_dense_kernel,
        out_shape=jax.ShapeDtypeStruct((n_p, f_out_p), jnp.bfloat16),
        grid_spec=pltpu.PrefetchScalarGridSpec(
            num_scalar_prefetch=0,
            grid=(n_p // tile_n,),
            in_specs=[
                pl.BlockSpec((tile_n, f_in_p), lambda i: (i, 0)),
                full((f_in_p, f_in_p)), full((1, f_in_p)),
                full((f_in_p, f_out_p)), full((1, f_out_p)),
            ],
            out_specs=pl.BlockSpec((tile_n, f_out_p), lambda i: (i, 0)),
        ),
        compiler_params=pltpu.CompilerParams(
            dimension_semantics=("parallel",),
            vmem_limit_bytes=vmem_limit),
    )(s_pad, w1, b1, w2, b2)

    # ---- kernel 2: per-edge RBF filter, gather, multiply ----
    use_onehot = n_p <= onehot_gather_max_nodes
    out_pad = pl.pallas_call(
        functools.partial(_edge_message_kernel, cutoff=float(cutoff),
                          n_nodes=n_p, use_onehot=use_onehot),
        out_shape=jax.ShapeDtypeStruct((e_p, f_out_p), out_dtype),
        grid_spec=pltpu.PrefetchScalarGridSpec(
            num_scalar_prefetch=0,
            grid=(e_p // tile_e,),
            in_specs=[
                pl.BlockSpec((tile_e, 1), lambda i: (i, 0)),    # dist
                pl.BlockSpec((tile_e, 1), lambda i: (i, 0)),    # j indices
                full((n_p, f_out_p)),                           # phi (grid-invariant)
                full((1, n_rbf_p)),                             # rbf coefficients
                full((n_rbf_p, f_out_p)), full((1, f_out_p)),   # dist_embed dense
            ],
            out_specs=pl.BlockSpec((tile_e, f_out_p), lambda i: (i, 0)),
        ),
        compiler_params=pltpu.CompilerParams(
            dimension_semantics=("parallel",),
            vmem_limit_bytes=vmem_limit),
    )(dist_pad, idx_pad, phi, coef, w_rbf, b_rbf)

    return out_pad[:n_edges, :f_out]


# --------------------------------------------------------------------------
# Params + pure-JAX reference (module semantics) for the correctness check
# --------------------------------------------------------------------------
def make_params(key, f_in, f_out, n_rbf):
    ks = jax.random.split(key, 3)

    def lin(k, fin, fout):
        kw, kb = jax.random.split(k)
        w = jax.random.normal(kw, (fin, fout), jnp.float32) / np.sqrt(fin)
        b = jax.random.normal(kb, (fout,), jnp.float32) * 0.1
        return w, b

    w1, b1 = lin(ks[0], f_in, f_in)
    w2, b2 = lin(ks[1], f_in, f_out)
    w_rbf, b_rbf = lin(ks[2], n_rbf, f_out)
    return dict(w1=w1, b1=b1, w2=w2, b2=b2, w_rbf=w_rbf, b_rbf=b_rbf)


def reference_forward(s_j, dist, nbrs, params, cutoff):
    h = _silu(s_j @ params["w1"] + params["b1"])
    phi = h @ params["w2"] + params["b2"]
    phi = phi[nbrs[:, 1]]                                    # gather j-nodes

    n_rbf = params["w_rbf"].shape[0]
    n = jnp.arange(1, n_rbf + 1, dtype=jnp.float32)
    d = dist[:, None]
    denom = jnp.where(d == 0.0, 1.0, d)
    rbf = jnp.where(d < cutoff, jnp.sin(n * jnp.pi / cutoff * d) / denom, 0.0)
    w_s = rbf @ params["w_rbf"] + params["b_rbf"]
    env = jnp.where(dist < cutoff, 0.5 * (jnp.cos(jnp.pi * dist / cutoff) + 1.0), 0.0)
    w_s = w_s * env[:, None]
    return phi * w_s


if __name__ == "__main__":
    N_NODES, N_EDGES = 12, 40
    F_IN = F_OUT = 32
    N_RBF = 16
    CUTOFF = 5.0

    key = jax.random.PRNGKey(0)
    k_s, k_d, k_n, k_p = jax.random.split(key, 4)

    s_j = jax.random.normal(k_s, (N_NODES, F_IN), jnp.float32)
    dist = jax.random.uniform(k_d, (N_EDGES,), jnp.float32, 0.3, 1.3 * CUTOFF)
    nbrs = jax.random.randint(k_n, (N_EDGES, 2), 0, N_NODES, dtype=jnp.int32)
    params = make_params(k_p, F_IN, F_OUT, N_RBF)

    out = invariant_message(s_j, dist, nbrs, params, CUTOFF)
    jax.block_until_ready(out)

    ref = reference_forward(s_j, dist, nbrs, params, CUTOFF)
    # bf16 MXU weights + bf16 output writeback dominate the error budget.
    np.testing.assert_allclose(np.asarray(out.astype(jnp.float32)),
                               np.asarray(ref), rtol=5e-2, atol=5e-2)

    print("KERNEL_OK")
</pallas_src>

<mosaic_0001>
module attributes {stable_mosaic.version = 11 : i64} {
  func.func @_inv_dense_kernel(%arg0: i32, %arg1: memref<16x128xbf16, #tpu.memory_space<vmem>>, %arg2: memref<128x128xbf16, #tpu.memory_space<vmem>>, %arg3: memref<1x128xf32, #tpu.memory_space<vmem>>, %arg4: memref<128x128xbf16, #tpu.memory_space<vmem>>, %arg5: memref<1x128xf32, #tpu.memory_space<vmem>>, %arg6: memref<16x128xbf16, #tpu.memory_space<vmem>>) attributes {dimension_semantics = [#tpu.dimension_semantics<parallel>], iteration_bounds = array<i64: 1>, scalar_prefetch = 0 : i64, scratch_operands = 0 : i64, tpu.core_type = #tpu.core_type<tc>, window_params = [{transform_indices = @transform_0, window_bounds = array<i64: 16, 128>}, {pipeline_mode = #tpu.pipeline_mode<synchronous>, transform_indices = @transform_1, window_bounds = array<i64: 128, 128>}, {pipeline_mode = #tpu.pipeline_mode<synchronous>, transform_indices = @transform_2, window_bounds = array<i64: 1, 128>}, {pipeline_mode = #tpu.pipeline_mode<synchronous>, transform_indices = @transform_3, window_bounds = array<i64: 128, 128>}, {pipeline_mode = #tpu.pipeline_mode<synchronous>, transform_indices = @transform_4, window_bounds = array<i64: 1, 128>}, {transform_indices = @transform_5, window_bounds = array<i64: 16, 128>}]} {
    %c0 = arith.constant 0 : index
    %c0_0 = arith.constant 0 : index
    %0 = vector.load %arg1[%c0, %c0_0] : memref<16x128xbf16, #tpu.memory_space<vmem>>, vector<16x128xbf16>
    %c0_1 = arith.constant 0 : index
    %c0_2 = arith.constant 0 : index
    %1 = vector.load %arg2[%c0_1, %c0_2] : memref<128x128xbf16, #tpu.memory_space<vmem>>, vector<128x128xbf16>
    %cst = arith.constant dense<0.000000e+00> : vector<16x128xf32>
    %2 = tpu.matmul %0, %1, %cst {dimension_numbers = #tpu.dot_dimension_numbers<[1], [0], [0], [1], [0, 0, 1, 1], [], []>} : vector<16x128xbf16>, vector<128x128xbf16>, vector<16x128xf32> -> vector<16x128xf32>
    %c0_3 = arith.constant 0 : index
    %c0_4 = arith.constant 0 : index
    %3 = vector.load %arg3[%c0_3, %c0_4] : memref<1x128xf32, #tpu.memory_space<vmem>>, vector<1x128xf32>
    %4 = vector.broadcast %3 : vector<1x128xf32> to vector<16x128xf32>
    %5 = arith.addf %2, %4 : vector<16x128xf32>
    %6 = arith.negf %5 : vector<16x128xf32>
    %7 = math.exp %6 : vector<16x128xf32>
    %cst_5 = arith.constant 1.000000e+00 : f32
    %8 = vector.broadcast %cst_5 : f32 to vector<16x128xf32>
    %9 = arith.addf %8, %7 : vector<16x128xf32>
    %10 = arith.divf %8, %9 : vector<16x128xf32>
    %11 = arith.mulf %5, %10 : vector<16x128xf32>
    %12 = arith.truncf %11 : vector<16x128xf32> to vector<16x128xbf16>
    %c0_6 = arith.constant 0 : index
    %c0_7 = arith.constant 0 : index
    %13 = vector.load %arg4[%c0_6, %c0_7] : memref<128x128xbf16, #tpu.memory_space<vmem>>, vector<128x128xbf16>
    %cst_8 = arith.constant dense<0.000000e+00> : vector<16x128xf32>
    %14 = tpu.matmul %12, %13, %cst_8 {dimension_numbers = #tpu.dot_dimension_numbers<[1], [0], [0], [1], [0, 0, 1, 1], [], []>} : vector<16x128xbf16>, vector<128x128xbf16>, vector<16x128xf32> -> vector<16x128xf32>
    %c0_9 = arith.constant 0 : index
    %c0_10 = arith.constant 0 : index
    %15 = vector.load %arg5[%c0_9, %c0_10] : memref<1x128xf32, #tpu.memory_space<vmem>>, vector<1x128xf32>
    %16 = vector.broadcast %15 : vector<1x128xf32> to vector<16x128xf32>
    %17 = arith.addf %14, %16 : vector<16x128xf32>
    %18 = arith.truncf %17 : vector<16x128xf32> to vector<16x128xbf16>
    %c0_11 = arith.constant 0 : index
    %c0_12 = arith.constant 0 : index
    %19 = vector.load %arg6[%c0_11, %c0_12] : memref<16x128xbf16, #tpu.memory_space<vmem>>, vector<16x128xbf16>
    tpu.vector_store %arg6[%c0_11, %c0_12], %18 {strides = array<i32>} : memref<16x128xbf16, #tpu.memory_space<vmem>>, vector<16x128xbf16>,
    return
  }
  func.func @transform_0(%arg0: i32) -> (i32, i32) {
    %c0_i32 = arith.constant 0 : i32
    %c0_i32_0 = arith.constant 0 : i32
    return %arg0, %c0_i32 : i32, i32
  }
  func.func @transform_1(%arg0: i32) -> (i32, i32) {
    %c0_i32 = arith.constant 0 : i32
    %c0_i32_0 = arith.constant 0 : i32
    %c0_i32_1 = arith.constant 0 : i32
    return %c0_i32, %c0_i32_0 : i32, i32
  }
  func.func @transform_2(%arg0: i32) -> (i32, i32) {
    %c0_i32 = arith.constant 0 : i32
    %c0_i32_0 = arith.constant 0 : i32
    %c0_i32_1 = arith.constant 0 : i32
    return %c0_i32, %c0_i32_0 : i32, i32
  }
  func.func @transform_3(%arg0: i32) -> (i32, i32) {
    %c0_i32 = arith.constant 0 : i32
    %c0_i32_0 = arith.constant 0 : i32
    %c0_i32_1 = arith.constant 0 : i32
    return %c0_i32, %c0_i32_0 : i32, i32
  }
  func.func @transform_4(%arg0: i32) -> (i32, i32) {
    %c0_i32 = arith.constant 0 : i32
    %c0_i32_0 = arith.constant 0 : i32
    %c0_i32_1 = arith.constant 0 : i32
    return %c0_i32, %c0_i32_0 : i32, i32
  }
  func.func @transform_5(%arg0: i32) -> (i32, i32) {
    %c0_i32 = arith.constant 0 : i32
    %c0_i32_0 = arith.constant 0 : i32
    return %arg0, %c0_i32 : i32, i32
  }
}

</mosaic_0001>

<bundles_post_ra>
// kernel: tpu_custom_call.1
= control target key start
LH: loop header
LB: loop body
LE: loop exit
PB: predicated region body
PF: predicated region fallthrough
CT: control target
= control target key end

     0   :  { %10 = vsyncpa [#allocation3], 0  ;;  %s581_s0 = inlined_call_operand.hbm [shape: bf16[16,128], index: 0, kind: input, shape index: {}]   ;;  %s582_s1 = inlined_call_operand.hbm [shape: bf16[128,128], index: 1, kind: input, shape index: {}]   ;;  %s583_s2 = inlined_call_operand.vmem [shape: f32[1,128], index: 2, kind: input, shape index: {}]   ;;  %s584_s3 = inlined_call_operand.hbm [shape: bf16[128,128], index: 3, kind: input, shape index: {}]   ;;  %s585_s4 = inlined_call_operand.vmem [shape: f32[1,128], index: 4, kind: input, shape index: {}]   ;;  %s586_s5 = inlined_call_operand.hbm [shape: bf16[16,128], index: 5, kind: output, shape index: {}]  }
   0x1   :  { %11 = vsyncpa [#allocation6], 0 }
   0x2   :  { %12 = vsyncpa [#allocation4], 0  ;;  %s30_s20 = sshll.u32 %s582_s1, 4  ;;  %s515_s21 = smov [#allocation5]   ;;  %s31_s20 = int_to_ptr.hbm [resolvable:$true] %s30_s20 }
   0x3   :  { %s32_s22 = sshll.u32 %s515_s21, 4  ;;  %s17_s25 = sshll.u32 %s581_s0, 4  ;;  %s33_s22 = int_to_ptr.vmem [resolvable:$true] %s32_s22  ;;  %s18_s25 = int_to_ptr.hbm [resolvable:$true] %s17_s25 }
   0x4   :  { %s516_s26 = smov 64   ;;  %s517_s27 = smov 4  }
   0x5   :  { %38 = dma.hbm_to_vmem [thread:$0]  %s31_s20, 1024, %s33_s22, [#allocation6], %s516_s26, %s516_s26, %s517_s27  }
   0x6   :  { %s518_s28 = smov [#allocation2]   ;;  %s45_s1 = sshll.u32 %s584_s3, 4  ;;  %s46_s1 = int_to_ptr.hbm [resolvable:$true] %s45_s1 }
   0x7   :  { %s19_s29 = sshll.u32 %s518_s28, 4  ;;  %s519_s0 = smov [#allocation7]   ;;  %s20_s29 = int_to_ptr.vmem [resolvable:$true] %s19_s29 }
   0x8   :  { %25 = dma.hbm_to_vmem [thread:$0]  %s18_s25, 128, %s20_s29, [#allocation3], %s516_s26, %s516_s26, %s517_s27  }
   0x9   :  { %s47_s7 = sshll.u32 %s519_s0, 4  ;;  %s48_s7 = int_to_ptr.vmem [resolvable:$true] %s47_s7 }
   0xa   :  { %53 = dma.hbm_to_vmem [thread:$0]  %s46_s1, 1024, %s48_s7, [#allocation6], %s516_s26, %s516_s26, %s517_s27  }
   0xb   :  { %509 = dma.done.wait [#allocation3], 128  }
   0xc   :  { %510 = vsyncadd [#allocation3], 4294967168 }
   0xd   :  { %511 = dma.done.wait [#allocation6], 2048  }
   0xe   :  { %512 = vsyncadd [#allocation6], 4294965248  ;;  %v383_v0 = vld [vmem:[#allocation5 + $0x38] sm:$0xff]  ;;  %v382_v1 = vld [vmem:[#allocation5 + $0x30] sm:$0xff]  ;;  %s520_s10 = smov [#allocation8]   ;;  %s291_s14 = sshll.u32 %s586_s5, 4  ;;  %s292_s14 = int_to_ptr.hbm [resolvable:$true] %s291_s14 }
   0xf   :  { %144 = vmatpush.bf16.msra.mxu0 %v383_v0  ;;  %v381_v2 = vld [vmem:[#allocation5 + $0x28] sm:$0xff]  ;;  %v380_v3 = vld [vmem:[#allocation5 + $0x20] sm:$0xff]  ;;  %v379_v4 = vld [vmem:[#allocation5 + $0x18] sm:$0xff]  ;;  %s289_s11 = sshll.u32 %s520_s10, 4  ;;  %s290_s11 = int_to_ptr.vmem [resolvable:$true] %s289_s11 }
  0x10   :  { %v378_v5 = vld [vmem:[#allocation5 + $0x10] sm:$0xff]  ;;  %v377_v6 = vld [vmem:[#allocation5 + $0x8] sm:$0xff]  ;;  %v376_v7 = vld [vmem:[#allocation5] sm:$0xff] }
  0x11   :  { %v375_v8 = vld [vmem:[#allocation2] sm:$0xff]  ;;  %v390_v10 = vld [vmem:[#allocation7 + $0x30] sm:$0xff]  ;;  %v389_v11 = vld [vmem:[#allocation7 + $0x28] sm:$0xff] }
  0x12   :  { %v391_v9 = vld [vmem:[#allocation7 + $0x38] sm:$0xff]  ;;  %v388_v12 = vld [vmem:[#allocation7 + $0x20] sm:$0xff]  ;;  %v386_v15 = vld [vmem:[#allocation7 + $0x10] sm:$0xff] }
  0x13   :  { %145 = vmatpush.bf16.msra.mxu0 %v382_v1  ;;  %267 = vmatpush.bf16.msra.mxu1 %v391_v9  ;;  %v387_v13 = vld [vmem:[#allocation7 + $0x18] sm:$0xff]  ;;  %v385_v18 = vld [vmem:[#allocation7 + $0x8] sm:$0xff]  ;;  %v384_v20 = vld [vmem:[#allocation7] sm:$0xff] }
  0x14   :  { %v403_v14 = vld [vmem:[%s583_s2] ss:$0 sm:$0xff] }
  0x15   :  { %v404_v52 = vld [vmem:[%s585_s4] ss:$0 sm:$0xff] }
  0x17   :  { %146 = vmatpush.bf16.msra.mxu0 %v381_v2  ;;  %268 = vmatpush.bf16.msra.mxu1 %v390_v10 }
  0x1b   :  { %147 = vmatpush.bf16.msra.mxu0 %v380_v3  ;;  %269 = vmatpush.bf16.msra.mxu1 %v389_v11 }
  0x1f   :  { %148 = vmatpush.bf16.msra.mxu0 %v379_v4  ;;  %270 = vmatpush.bf16.msra.mxu1 %v388_v12 }
  0x23   :  { %149 = vmatpush.bf16.msra.mxu0 %v378_v5  ;;  %271 = vmatpush.bf16.msra.mxu1 %v387_v13 }
  0x27   :  { %150 = vmatpush.bf16.msra.mxu0 %v377_v6  ;;  %272 = vmatpush.bf16.msra.mxu1 %v386_v15 }
  0x2b   :  { %151 = vmatpush.bf16.msra.mxu0 %v376_v7  ;;  %273 = vmatpush.bf16.msra.mxu1 %v385_v18 }
  0x2e   :  { %152 = vmatmul.bf16.vlgmr.msra.gmra.mxu0 %v375_v8 }
  0x2f   :  { %274 = vmatpush.bf16.msra.mxu1 %v384_v20 }
  0xab   :  { %v153_v16 = vpop.f32.mrf.mxu0 }
  0xac   :  { %v154_v17 = vadd.f32 %v403_v14, %v153_v16 }
  0xae   :  { %v341_v19 = vmul.f32 -1.442695, %v154_v17 }
  0xb0   :  { %405 = vpow2.f32 %v341_v19 }
  0xb3   :  { %v155_v21 = vpop.f32.mrf.mxu0 }
  0xb4   :  { %v156_v22 = vadd.f32 %v403_v14, %v155_v21 }
  0xb6   :  { %v406_v23 = vpop.eup %405  ;;  %v342_v24 = vmul.f32 -1.442695, %v156_v22 }
  0xb7   :  { %v164_v25 = vadd.f32 1.0, %v406_v23 }
  0xb8   :  { %407 = vpow2.f32 %v342_v24 }
  0xb9   :  { %409 = vrcp.f32 %v164_v25  ;;  %v177_v35 = vand.u32 2147483648, %v164_v25  ;;  %vm171_vm1 = vweird.f32 %v164_v25  ;;  %v175_v36 = vand.u32 2147483647, %v164_v25 }
  0xbb   :  { %v178_v42 = vor.u32 1.1754944e-38, %v177_v35  ;;  %vm176_vm4 = vcmp.eq.f32.partialorder %v175_v36, 8.507059e+37 }
  0xbe   :  { %v408_v26 = vpop.eup %407 }
  0xbf   :  { %v410_v27 = vpop.eup %409  ;;  %v165_v28 = vadd.f32 1.0, %v408_v26 }
  0xc0   :  { %v167_v29 = vmul.f32 %v410_v27, %v164_v25  ;;  %vm172_vm0 = vweird.f32 %v410_v27 }
  0xc1   :  { %411 = vrcp.f32 %v165_v28  ;;  %vm173_vm2 = vmor %vm171_vm1, %vm172_vm0  ;;  %v192_v38 = vand.u32 2147483648, %v165_v28  ;;  %v190_v41 = vand.u32 2147483647, %v165_v28  ;;  %vm186_vm5 = vweird.f32 %v165_v28 }
  0xc2   :  { %v168_v30 = vsub.f32 1.0, %v167_v29 }
  0xc3   :  { %v193_v45 = vor.u32 1.1754944e-38, %v192_v38  ;;  %vm191_vm7 = vcmp.eq.f32.partialorder %v190_v41, 8.507059e+37 }
  0xc4   :  { %v169_v31 = vmul.f32 %v410_v27, %v168_v30 }
  0xc6   :  { %v170_v33 = vadd.f32 %v410_v27, %v169_v31 }
  0xc7   :  { %v412_v32 = vpop.eup %411 }
  0xc8   :  { %v182_v34 = vmul.f32 %v412_v32, %v165_v28  ;;  %v174_v39 = vsel %vm173_vm2, %v410_v27, %v170_v33  ;;  %vm187_vm3 = vweird.f32 %v412_v32 }
  0xc9   :  { %v179_v44 = vsel %vm176_vm4, %v178_v42, %v174_v39  ;;  %vm188_vm6 = vmor %vm186_vm5, %vm187_vm3 }
  0xca   :  { %v183_v37 = vsub.f32 1.0, %v182_v34  ;;  %v196_v48 = vmul.f32 %v179_v44, %v154_v17 }
  0xcc   :  { %v184_v40 = vmul.f32 %v412_v32, %v183_v37 }
  0xce   :  { %v185_v43 = vadd.f32 %v412_v32, %v184_v40 }
  0xd0   :  { %v189_v46 = vsel %vm188_vm6, %v412_v32, %v185_v43 }
  0xd1   :  { %v194_v47 = vsel %vm191_vm7, %v193_v45, %v189_v46 }
  0xd2   :  { %v197_v49 = vmul.f32 %v194_v47, %v156_v22 }
  0xd4   :  { %v198_v50 = vpack.c.bf16 %v197_v49, %v196_v48 }
  0xd6   :  { %275 = vmatmul.bf16.vlgmr.msra.gmra.mxu1 %v198_v50 }
 0x153   :  { %v276_v51 = vpop.f32.mrf.mxu1 }
 0x154   :  { %v277_v54 = vadd.f32 %v404_v52, %v276_v51 }
 0x15b   :  { %v278_v53 = vpop.f32.mrf.mxu1 }
 0x15c   :  { %v279_v55 = vadd.f32 %v404_v52, %v278_v53 }
 0x15e   :  { %v395_v56 = vpack.c.bf16 %v279_v55, %v277_v54 }
 0x160   :  { %396 = vst [vmem:[#allocation8] sm:$0xff] %v395_v56  }
 0x161   :  { %297 = dma.vmem_to_hbm [thread:$0]  %s290_s11, 128, %s292_s14, [#allocation4], %s516_s26, %s516_s26, %s517_s27  }
 0x162   :  { %513 = dma.done.wait [#allocation4], 128  }
 0x163   :  { %514 = vsyncadd [#allocation4], 4294967168 }
 0x164   :  { %302 = vsyncpa [#allocation3], 1 }
 0x165   :  { %303 = vsyncpa [#allocation6], 1 }
 0x166   :  { %304 = vsyncpa [#allocation4], 1 }

</bundles_post_ra>
